<compile_context>
chip_gen: v7x
topology: tpu7x:2x2x1
jax: 0.10.0
libtpu: 0.0.40
codegen_flags: <defaults>
</compile_context>

<pallas_src>
import functools
import math

import jax
import jax.numpy as jnp
from jax import lax
from jax.experimental import pallas as pl
from jax.experimental.pallas import tpu as pltpu

# ---------------------------------------------------------------- config ----
B = 2          # batch
D = 4          # input_dim
S = 8          # input_size (sequence length)
E = 32         # attention_embedding_size
H = 1          # attention_heads
A = 1          # attention_layers
LIN = 4        # linear_layers  -> (LIN-2) E->E layers + one E->D layer
MID = max(0, LIN - 2)
FORECAST = 4
THETA = S + FORECAST        # generic basis: theta = backcast_size + forecast_size


# ------------------------------------------------- packed parameter layout ----
def _round8(n):
    return ((n + 7) // 8) * 8


def _build_layout():
    """Static row offsets (8-sublane aligned) of every tensor inside the packed buffer."""
    layout = {}
    off = 0

    def add(name, rows):
        nonlocal off
        layout[name] = off
        off += _round8(rows)

    add("w_in", D)                          # (D, E)   input layer W^T
    add("b_in", 1)                          # (1, E)
    for a in range(A):
        add(f"wq{a}", E)                    # (E, E)   Q projection W^T (scale folded in)
        add(f"wk{a}", E)                    # (E, E)
        add(f"wv{a}", E)                    # (E, E)
        add(f"bq{a}", 1)
        add(f"bk{a}", 1)
        add(f"bv{a}", 1)
        add(f"wo{a}", E)                    # (E, E)   out_proj W^T
        add(f"bo{a}", 1)
    for l in range(MID):
        add(f"wm{l}", E)                    # (E, E)
        add(f"bm{l}", 1)
    add("w_last", E)                        # (E, D)
    add("b_last", 1)                        # (1, D)
    add("w_bas", S)                         # (S, THETA)
    add("b_bas", 1)                         # (1, THETA)
    return layout, off


LAYOUT, P_ROWS = _build_layout()            # P_ROWS = 312  (multiple of 8)
P_COLS = E                                  # lane width of the packed buffer


# ---------------------------------------------------------------- kernel ----
def _block_kernel(x_ref, p_ref, o_ref, *, heads, attn_layers, mid_layers):
    f32 = jnp.float32

    def W(name, rows, cols):                # static slice of the packed param block
        off = LAYOUT[name]
        return p_ref[off:off + rows, :cols]

    h = x_ref[0]                                             # (S, D) — one batch item

    # input layer + relu : (S, D) @ (D, E)
    h = jnp.maximum(
        jnp.dot(h, W("w_in", D, E), preferred_element_type=f32) + W("b_in", 1, E), 0.0)

    hd = E // heads

    # self-attention layers (nn.MultiheadAttention, eval: no dropout)
    for a in range(attn_layers):
        # three lane-aligned projections; 1/sqrt(hd) already folded into Q weights/bias
        q = jnp.dot(h, W(f"wq{a}", E, E), preferred_element_type=f32) + W(f"bq{a}", 1, E)
        k = jnp.dot(h, W(f"wk{a}", E, E), preferred_element_type=f32) + W(f"bk{a}", 1, E)
        v = jnp.dot(h, W(f"wv{a}", E, E), preferred_element_type=f32) + W(f"bv{a}", 1, E)

        head_outs = []
        for hh in range(heads):                              # static loop over heads
            lo = hh * hd
            qh = q[:, lo:lo + hd]
            kh = k[:, lo:lo + hd]
            vh = v[:, lo:lo + hd]

            # scores = q @ k^T (contract last dims; no explicit transpose op)
            s = lax.dot_general(qh, kh, (((1,), (1,)), ((), ())),
                                preferred_element_type=f32)  # (S, S)
            s = s - jnp.max(s, axis=-1, keepdims=True)
            p = jnp.exp(s)
            inv = pl.reciprocal(jnp.sum(p, axis=-1, keepdims=True), approx=True)
            head_outs.append(
                jnp.dot(p, vh, preferred_element_type=f32) * inv)        # (S, hd)
        ctx = head_outs[0] if heads == 1 else jnp.concatenate(head_outs, axis=-1)

        h = jnp.dot(ctx, W(f"wo{a}", E, E), preferred_element_type=f32) + W(f"bo{a}", 1, E)

    # fully-connected stack with relu
    for l in range(mid_layers):
        h = jnp.maximum(
            jnp.dot(h, W(f"wm{l}", E, E), preferred_element_type=f32)
            + W(f"bm{l}", 1, E), 0.0)
    h = jnp.maximum(
        jnp.dot(h, W("w_last", E, D), preferred_element_type=f32)
        + W("b_last", 1, D), 0.0)                            # (S, D)

    # basis parameters: contract over the time axis.  Tiny operands — any Mosaic
    # relayout here is negligible at (8,4)x(8,12).
    th = lax.dot_general(h, W("w_bas", S, THETA), (((0,), (0,)), ((), ())),
                         preferred_element_type=f32)         # (D, THETA)
    o_ref[0] = th + W("b_bas", 1, THETA)                     # single store per step


# ------------------------------------------------------- one-time packing ----
def pack_params(params):
    """Transpose / split / scale-fold / pack all weights ONCE into a (P_ROWS, E) buffer."""
    (w_in, b_in, a_inw, a_inb, a_ow, a_ob,
     w_mid, b_mid, w_last, b_last, w_bas, b_bas) = params

    hd = E // H
    scale = 1.0 / math.sqrt(hd)
    buf = jnp.zeros((P_ROWS, P_COLS), jnp.float32)

    def put(buf, name, mat):
        mat = jnp.asarray(mat, jnp.float32)
        if mat.ndim == 1:
            mat = mat[None, :]
        return lax.dynamic_update_slice(buf, mat, (LAYOUT[name], 0))

    buf = put(buf, "w_in", w_in.T)                           # (D, E)
    buf = put(buf, "b_in", b_in)
    for a in range(A):
        buf = put(buf, f"wq{a}", (a_inw[a, :E] * scale).T)   # fold 1/sqrt(hd) into Q
        buf = put(buf, f"wk{a}", a_inw[a, E:2 * E].T)
        buf = put(buf, f"wv{a}", a_inw[a, 2 * E:].T)
        buf = put(buf, f"bq{a}", a_inb[a, :E] * scale)
        buf = put(buf, f"bk{a}", a_inb[a, E:2 * E])
        buf = put(buf, f"bv{a}", a_inb[a, 2 * E:])
        buf = put(buf, f"wo{a}", a_ow[a].T)
        buf = put(buf, f"bo{a}", a_ob[a])
    for l in range(MID):
        buf = put(buf, f"wm{l}", w_mid[l].T)
        buf = put(buf, f"bm{l}", b_mid[l])
    buf = put(buf, "w_last", w_last.T)                       # (E, D)
    buf = put(buf, "b_last", b_last)
    buf = put(buf, "w_bas", w_bas.T)                         # (S, THETA)
    buf = put(buf, "b_bas", b_bas)
    return buf


# --------------------------------------------------------------- wrapper ----
@jax.jit
def time_attention_nbeats_block(x, packed):
    x_bsd = jnp.transpose(x, (0, 2, 1))                      # (B, S, D), fuses under jit

    kernel = functools.partial(_block_kernel, heads=H,
                               attn_layers=A, mid_layers=MID)

    theta = pl.pallas_call(
        kernel,
        out_shape=jax.ShapeDtypeStruct((B, D, THETA), jnp.float32),
        grid_spec=pltpu.PrefetchScalarGridSpec(
            num_scalar_prefetch=0,
            grid=(B,),                                       # batch over a parallel grid axis
            in_specs=[
                pl.BlockSpec((1, S, D), lambda b: (b, 0, 0)),          # one batch item
                pl.BlockSpec((P_ROWS, P_COLS), lambda b: (0, 0)),      # packed params (1 DMA)
            ],
            out_specs=pl.BlockSpec((1, D, THETA), lambda b: (b, 0, 0)),
        ),
        compiler_params=pltpu.CompilerParams(dimension_semantics=("parallel",)),
    )(x_bsd, packed)

    # basis_function (generic N-BEATS basis): plain-JAX glue (just slicing)
    # TODO(synk): only the generic slicing basis is implemented; other basis_function
    # modules (trend/seasonality) would need their own epilogue.
    backcast = theta[:, :, :S]
    forecast = theta[:, :, S:]
    return backcast, forecast


# ----------------------------------------------------------------- params ---
def init_params(key):
    keys = jax.random.split(key, 8)

    def linear(k, out_f, in_f):
        bound = 1.0 / math.sqrt(in_f)
        kw, kb = jax.random.split(k)
        w = jax.random.uniform(kw, (out_f, in_f), jnp.float32, -bound, bound)
        b = jax.random.uniform(kb, (out_f,), jnp.float32, -bound, bound)
        return w, b

    w_in, b_in = linear(keys[0], E, D)

    a_inw, a_inb, a_ow, a_ob = [], [], [], []
    for i in range(A):
        wi, bi = linear(jax.random.fold_in(keys[1], i), 3 * E, E)
        wo, bo = linear(jax.random.fold_in(keys[2], i), E, E)
        a_inw.append(wi); a_inb.append(bi); a_ow.append(wo); a_ob.append(bo)
    a_inw, a_inb = jnp.stack(a_inw), jnp.stack(a_inb)
    a_ow, a_ob = jnp.stack(a_ow), jnp.stack(a_ob)

    w_mid, b_mid = [], []
    for i in range(MID):
        w, bb = linear(jax.random.fold_in(keys[3], i), E, E)
        w_mid.append(w); b_mid.append(bb)
    w_mid, b_mid = jnp.stack(w_mid), jnp.stack(b_mid)

    w_last, b_last = linear(keys[4], D, E)
    w_bas, b_bas = linear(keys[5], THETA, S)

    return (w_in, b_in, a_inw, a_inb, a_ow, a_ob,
            w_mid, b_mid, w_last, b_last, w_bas, b_bas)


# ------------------------------------------------------------- reference ----
def reference(x, params):
    (w_in, b_in, a_inw, a_inb, a_ow, a_ob,
     w_mid, b_mid, w_last, b_last, w_bas, b_bas) = params
    h = jnp.maximum(jnp.einsum('bds,ed->bse', x, w_in) + b_in, 0.0)
    hd = E // H
    scale = 1.0 / math.sqrt(hd)
    for a in range(A):
        q = jnp.einsum('bse,fe->bsf', h, a_inw[a, :E]) + a_inb[a, :E]
        k = jnp.einsum('bse,fe->bsf', h, a_inw[a, E:2 * E]) + a_inb[a, E:2 * E]
        v = jnp.einsum('bse,fe->bsf', h, a_inw[a, 2 * E:]) + a_inb[a, 2 * E:]
        outs = []
        for hh in range(H):
            lo, hi = hh * hd, (hh + 1) * hd
            s = jnp.einsum('bqe,bke->bqk', q[..., lo:hi], k[..., lo:hi]) * scale
            p = jax.nn.softmax(s, axis=-1)
            outs.append(jnp.einsum('bqk,bke->bqe', p, v[..., lo:hi]))
        ctx = jnp.concatenate(outs, axis=-1)
        h = jnp.einsum('bse,fe->bsf', ctx, a_ow[a]) + a_ob[a]
    for l in range(MID):
        h = jnp.maximum(jnp.einsum('bse,fe->bsf', h, w_mid[l]) + b_mid[l], 0.0)
    h = jnp.maximum(jnp.einsum('bse,de->bsd', h, w_last) + b_last, 0.0)
    theta = jnp.einsum('bsd,ts->bdt', h, w_bas) + b_bas
    return theta[:, :, :S], theta[:, :, S:]


# ------------------------------------------------------------------ main ----
if __name__ == "__main__":
    key = jax.random.PRNGKey(0)
    kx, kp = jax.random.split(key)
    x = jax.random.normal(kx, (B, D, S), jnp.float32)   # (batch, input_dim, input_size)
    params = init_params(kp)
    packed = pack_params(params)                        # one-time layout prep / packing

    backcast, forecast = time_attention_nbeats_block(x, packed)
    backcast, forecast = jax.block_until_ready((backcast, forecast))

    bc_ref, fc_ref = reference(x, params)
    assert backcast.shape == (B, D, S) and forecast.shape == (B, D, FORECAST)
    # tolerance 1e-3: kernel uses the EUP approximate reciprocal in the softmax
    assert jnp.allclose(backcast, bc_ref, rtol=1e-3, atol=1e-3)
    assert jnp.allclose(forecast, fc_ref, rtol=1e-3, atol=1e-3)
    print("KERNEL_OK")
</pallas_src>

<mosaic_0001>
module attributes {stable_mosaic.version = 11 : i64} {
  func.func @_block_kernel(%arg0: i32, %arg1: memref<1x8x4xf32, #tpu.memory_space<vmem>>, %arg2: memref<312x32xf32, #tpu.memory_space<vmem>>, %arg3: memref<1x4x12xf32, #tpu.memory_space<vmem>>) attributes {dimension_semantics = [#tpu.dimension_semantics<parallel>], iteration_bounds = array<i64: 2>, scalar_prefetch = 0 : i64, scratch_operands = 0 : i64, tpu.core_type = #tpu.core_type<tc>, window_params = [{transform_indices = @transform_0, window_bounds = array<i64: 1, 8, 4>}, {pipeline_mode = #tpu.pipeline_mode<synchronous>, transform_indices = @transform_1, window_bounds = array<i64: 312, 32>}, {transform_indices = @transform_2, window_bounds = array<i64: 1, 4, 12>}]} {
    %c0 = arith.constant 0 : index
    %c0_0 = arith.constant 0 : index
    %c0_1 = arith.constant 0 : index
    %0 = vector.load %arg1[%c0, %c0_0, %c0_1] : memref<1x8x4xf32, #tpu.memory_space<vmem>>, vector<1x8x4xf32>
    %1 = vector.shape_cast %0 : vector<1x8x4xf32> to vector<8x4xf32>
    %c0_2 = arith.constant 0 : index
    %c0_3 = arith.constant 0 : index
    %2 = vector.load %arg2[%c0_2, %c0_3] : memref<312x32xf32, #tpu.memory_space<vmem>>, vector<4x32xf32>
    %cst = arith.constant dense<0.000000e+00> : vector<8x32xf32>
    %3 = tpu.matmul %1, %2, %cst {dimension_numbers = #tpu.dot_dimension_numbers<[1], [0], [0], [1], [0, 0, 1, 1], [], []>} : vector<8x4xf32>, vector<4x32xf32>, vector<8x32xf32> -> vector<8x32xf32>
    %c8 = arith.constant 8 : index
    %c0_4 = arith.constant 0 : index
    %4 = vector.load %arg2[%c8, %c0_4] : memref<312x32xf32, #tpu.memory_space<vmem>>, vector<1x32xf32>
    %5 = vector.broadcast %4 : vector<1x32xf32> to vector<8x32xf32>
    %6 = arith.addf %3, %5 : vector<8x32xf32>
    %cst_5 = arith.constant 0.000000e+00 : f32
    %7 = vector.broadcast %cst_5 : f32 to vector<8x32xf32>
    %8 = arith.maximumf %6, %7 : vector<8x32xf32>
    %c16 = arith.constant 16 : index
    %c0_6 = arith.constant 0 : index
    %9 = vector.load %arg2[%c16, %c0_6] : memref<312x32xf32, #tpu.memory_space<vmem>>, vector<32x32xf32>
    %cst_7 = arith.constant dense<0.000000e+00> : vector<8x32xf32>
    %10 = tpu.matmul %8, %9, %cst_7 {dimension_numbers = #tpu.dot_dimension_numbers<[1], [0], [0], [1], [0, 0, 1, 1], [], []>} : vector<8x32xf32>, vector<32x32xf32>, vector<8x32xf32> -> vector<8x32xf32>
    %c112 = arith.constant 112 : index
    %c0_8 = arith.constant 0 : index
    %11 = vector.load %arg2[%c112, %c0_8] : memref<312x32xf32, #tpu.memory_space<vmem>>, vector<1x32xf32>
    %12 = vector.broadcast %11 : vector<1x32xf32> to vector<8x32xf32>
    %13 = arith.addf %10, %12 : vector<8x32xf32>
    %c48 = arith.constant 48 : index
    %c0_9 = arith.constant 0 : index
    %14 = vector.load %arg2[%c48, %c0_9] : memref<312x32xf32, #tpu.memory_space<vmem>>, vector<32x32xf32>
    %cst_10 = arith.constant dense<0.000000e+00> : vector<8x32xf32>
    %15 = tpu.matmul %8, %14, %cst_10 {dimension_numbers = #tpu.dot_dimension_numbers<[1], [0], [0], [1], [0, 0, 1, 1], [], []>} : vector<8x32xf32>, vector<32x32xf32>, vector<8x32xf32> -> vector<8x32xf32>
    %c120 = arith.constant 120 : index
    %c0_11 = arith.constant 0 : index
    %16 = vector.load %arg2[%c120, %c0_11] : memref<312x32xf32, #tpu.memory_space<vmem>>, vector<1x32xf32>
    %17 = vector.broadcast %16 : vector<1x32xf32> to vector<8x32xf32>
    %18 = arith.addf %15, %17 : vector<8x32xf32>
    %c80 = arith.constant 80 : index
    %c0_12 = arith.constant 0 : index
    %19 = vector.load %arg2[%c80, %c0_12] : memref<312x32xf32, #tpu.memory_space<vmem>>, vector<32x32xf32>
    %cst_13 = arith.constant dense<0.000000e+00> : vector<8x32xf32>
    %20 = tpu.matmul %8, %19, %cst_13 {dimension_numbers = #tpu.dot_dimension_numbers<[1], [0], [0], [1], [0, 0, 1, 1], [], []>} : vector<8x32xf32>, vector<32x32xf32>, vector<8x32xf32> -> vector<8x32xf32>
    %c128 = arith.constant 128 : index
    %c0_14 = arith.constant 0 : index
    %21 = vector.load %arg2[%c128, %c0_14] : memref<312x32xf32, #tpu.memory_space<vmem>>, vector<1x32xf32>
    %22 = vector.broadcast %21 : vector<1x32xf32> to vector<8x32xf32>
    %23 = arith.addf %20, %22 : vector<8x32xf32>
    %cst_15 = arith.constant dense<0.000000e+00> : vector<8x8xf32>
    %24 = tpu.matmul %13, %18, %cst_15 {dimension_numbers = #tpu.dot_dimension_numbers<[1], [1], [0], [0], [0, 0, 1, 0], [], []>} : vector<8x32xf32>, vector<8x32xf32>, vector<8x8xf32> -> vector<8x8xf32>
    %cst_16 = arith.constant dense<0xFF800000> : vector<8xf32>
    %25 = vector.multi_reduction <maximumf>, %24, %cst_16 [1] : vector<8x8xf32> to vector<8xf32>
    %26 = vector.shape_cast %25 : vector<8xf32> to vector<8x1xf32>
    %27 = vector.broadcast %26 : vector<8x1xf32> to vector<8x8xf32>
    %28 = arith.subf %24, %27 : vector<8x8xf32>
    %29 = math.exp %28 : vector<8x8xf32>
    %cst_17 = arith.constant dense<0.000000e+00> : vector<8xf32>
    %30 = vector.multi_reduction <add>, %29, %cst_17 [1] : vector<8x8xf32> to vector<8xf32>
    %31 = vector.shape_cast %30 : vector<8xf32> to vector<8x1xf32>
    %32 = tpu.reciprocal %31 {approx = true} : vector<8x1xf32> -> vector<8x1xf32>
    %cst_18 = arith.constant dense<0.000000e+00> : vector<8x32xf32>
    %33 = tpu.matmul %29, %23, %cst_18 {dimension_numbers = #tpu.dot_dimension_numbers<[1], [0], [0], [1], [0, 0, 1, 1], [], []>} : vector<8x8xf32>, vector<8x32xf32>, vector<8x32xf32> -> vector<8x32xf32>
    %34 = vector.broadcast %32 : vector<8x1xf32> to vector<8x32xf32>
    %35 = arith.mulf %33, %34 : vector<8x32xf32>
    %c136 = arith.constant 136 : index
    %c0_19 = arith.constant 0 : index
    %36 = vector.load %arg2[%c136, %c0_19] : memref<312x32xf32, #tpu.memory_space<vmem>>, vector<32x32xf32>
    %cst_20 = arith.constant dense<0.000000e+00> : vector<8x32xf32>
    %37 = tpu.matmul %35, %36, %cst_20 {dimension_numbers = #tpu.dot_dimension_numbers<[1], [0], [0], [1], [0, 0, 1, 1], [], []>} : vector<8x32xf32>, vector<32x32xf32>, vector<8x32xf32> -> vector<8x32xf32>
    %c168 = arith.constant 168 : index
    %c0_21 = arith.constant 0 : index
    %38 = vector.load %arg2[%c168, %c0_21] : memref<312x32xf32, #tpu.memory_space<vmem>>, vector<1x32xf32>
    %39 = vector.broadcast %38 : vector<1x32xf32> to vector<8x32xf32>
    %40 = arith.addf %37, %39 : vector<8x32xf32>
    %c176 = arith.constant 176 : index
    %c0_22 = arith.constant 0 : index
    %41 = vector.load %arg2[%c176, %c0_22] : memref<312x32xf32, #tpu.memory_space<vmem>>, vector<32x32xf32>
    %cst_23 = arith.constant dense<0.000000e+00> : vector<8x32xf32>
    %42 = tpu.matmul %40, %41, %cst_23 {dimension_numbers = #tpu.dot_dimension_numbers<[1], [0], [0], [1], [0, 0, 1, 1], [], []>} : vector<8x32xf32>, vector<32x32xf32>, vector<8x32xf32> -> vector<8x32xf32>
    %c208 = arith.constant 208 : index
    %c0_24 = arith.constant 0 : index
    %43 = vector.load %arg2[%c208, %c0_24] : memref<312x32xf32, #tpu.memory_space<vmem>>, vector<1x32xf32>
    %44 = vector.broadcast %43 : vector<1x32xf32> to vector<8x32xf32>
    %45 = arith.addf %42, %44 : vector<8x32xf32>
    %cst_25 = arith.constant 0.000000e+00 : f32
    %46 = vector.broadcast %cst_25 : f32 to vector<8x32xf32>
    %47 = arith.maximumf %45, %46 : vector<8x32xf32>
    %c216 = arith.constant 216 : index
    %c0_26 = arith.constant 0 : index
    %48 = vector.load %arg2[%c216, %c0_26] : memref<312x32xf32, #tpu.memory_space<vmem>>, vector<32x32xf32>
    %cst_27 = arith.constant dense<0.000000e+00> : vector<8x32xf32>
    %49 = tpu.matmul %47, %48, %cst_27 {dimension_numbers = #tpu.dot_dimension_numbers<[1], [0], [0], [1], [0, 0, 1, 1], [], []>} : vector<8x32xf32>, vector<32x32xf32>, vector<8x32xf32> -> vector<8x32xf32>
    %c248 = arith.constant 248 : index
    %c0_28 = arith.constant 0 : index
    %50 = vector.load %arg2[%c248, %c0_28] : memref<312x32xf32, #tpu.memory_space<vmem>>, vector<1x32xf32>
    %51 = vector.broadcast %50 : vector<1x32xf32> to vector<8x32xf32>
    %52 = arith.addf %49, %51 : vector<8x32xf32>
    %cst_29 = arith.constant 0.000000e+00 : f32
    %53 = vector.broadcast %cst_29 : f32 to vector<8x32xf32>
    %54 = arith.maximumf %52, %53 : vector<8x32xf32>
    %c256 = arith.constant 256 : index
    %c0_30 = arith.constant 0 : index
    %55 = vector.load %arg2[%c256, %c0_30] : memref<312x32xf32, #tpu.memory_space<vmem>>, vector<32x4xf32>
    %cst_31 = arith.constant dense<0.000000e+00> : vector<8x4xf32>
    %56 = tpu.matmul %54, %55, %cst_31 {dimension_numbers = #tpu.dot_dimension_numbers<[1], [0], [0], [1], [0, 0, 1, 1], [], []>} : vector<8x32xf32>, vector<32x4xf32>, vector<8x4xf32> -> vector<8x4xf32>
    %c288 = arith.constant 288 : index
    %c0_32 = arith.constant 0 : index
    %57 = vector.load %arg2[%c288, %c0_32] : memref<312x32xf32, #tpu.memory_space<vmem>>, vector<1x4xf32>
    %58 = vector.broadcast %57 : vector<1x4xf32> to vector<8x4xf32>
    %59 = arith.addf %56, %58 : vector<8x4xf32>
    %cst_33 = arith.constant 0.000000e+00 : f32
    %60 = vector.broadcast %cst_33 : f32 to vector<8x4xf32>
    %61 = arith.maximumf %59, %60 : vector<8x4xf32>
    %c296 = arith.constant 296 : index
    %c0_34 = arith.constant 0 : index
    %62 = vector.load %arg2[%c296, %c0_34] : memref<312x32xf32, #tpu.memory_space<vmem>>, vector<8x12xf32>
    %cst_35 = arith.constant dense<0.000000e+00> : vector<4x12xf32>
    %63 = tpu.matmul %61, %62, %cst_35 {dimension_numbers = #tpu.dot_dimension_numbers<[0], [0], [1], [1], [0, 1, 1, 1], [], []>} : vector<8x4xf32>, vector<8x12xf32>, vector<4x12xf32> -> vector<4x12xf32>
    %c304 = arith.constant 304 : index
    %c0_36 = arith.constant 0 : index
    %64 = vector.load %arg2[%c304, %c0_36] : memref<312x32xf32, #tpu.memory_space<vmem>>, vector<1x12xf32>
    %65 = vector.broadcast %64 : vector<1x12xf32> to vector<4x12xf32>
    %66 = arith.addf %63, %65 : vector<4x12xf32>
    %c0_37 = arith.constant 0 : index
    %c0_38 = arith.constant 0 : index
    %c0_39 = arith.constant 0 : index
    %67 = vector.load %arg3[%c0_37, %c0_38, %c0_39] : memref<1x4x12xf32, #tpu.memory_space<vmem>>, vector<1x4x12xf32>
    %68 = vector.shape_cast %67 : vector<1x4x12xf32> to vector<4x12xf32>
    %69 = vector.shape_cast %66 : vector<4x12xf32> to vector<1x4x12xf32>
    tpu.vector_store %arg3[%c0_37, %c0_38, %c0_39], %69 {strides = array<i32>} : memref<1x4x12xf32, #tpu.memory_space<vmem>>, vector<1x4x12xf32>,
    return
  }
  func.func @transform_0(%arg0: i32) -> (i32, i32, i32) {
    %c0_i32 = arith.constant 0 : i32
    %c0_i32_0 = arith.constant 0 : i32
    %c0_i32_1 = arith.constant 0 : i32
    return %arg0, %c0_i32, %c0_i32_0 : i32, i32, i32
  }
  func.func @transform_1(%arg0: i32) -> (i32, i32) {
    %c0_i32 = arith.constant 0 : i32
    %c0_i32_0 = arith.constant 0 : i32
    %c0_i32_1 = arith.constant 0 : i32
    return %c0_i32, %c0_i32_0 : i32, i32
  }
  func.func @transform_2(%arg0: i32) -> (i32, i32, i32) {
    %c0_i32 = arith.constant 0 : i32
    %c0_i32_0 = arith.constant 0 : i32
    %c0_i32_1 = arith.constant 0 : i32
    return %arg0, %c0_i32, %c0_i32_0 : i32, i32, i32
  }
}

</mosaic_0001>

<bundles_post_ra>
// kernel: time_attention_nbeats_block.1
= control target key start
LH: loop header
LB: loop body
LE: loop exit
PB: predicated region body
PF: predicated region fallthrough
CT: control target
= control target key end

     0   :  { %s1378_s9 = smov 0   ;;  %s1569_s0 = inlined_call_operand.vmem [shape: f32[2,8,4], index: 0, kind: input, shape index: {}]   ;;  %s1570_s1 = inlined_call_operand.vmem [shape: f32[312,32], index: 1, kind: input, shape index: {}]   ;;  %s1571_s2 = inlined_call_operand.vmem [shape: f32[2,4,12], index: 2, kind: output, shape index: {}]  }
   0x1 LB: > { %s1124_s10 = sadd.s32 4294967295, %s1358_s9   ;;  %p1128_p0 = scmp.ge.s32.totalorder %s1358_s9, 1  ;;  %s1358_s9 = sphi %s1378_s9, %s12_s9  }
   0x2   : > { %p111_p1 = scmp.lt.s32.totalorder %s1358_s9, 3 }
   0x4   : > { %p112_p2 = pnand %p1128_p0, %p111_p1 }
   0x5   : > { %v140_v0 = vld [vmem:[%s1570_s1] sm:$0xf] (!%p112_p2)  ;;  %vm150_vm0 = vcmask (!%p112_p2), 1043456   ;;  %p131_p3 = scmp.lt.s32.totalorder (!%p112_p2), %s1124_s10, 1  ;;  %v1360_v1 = vmov (!%p112_p2), 0.0   ;;  %vm1361_vm1 = vmmov (!%p112_p2), 0  }
   0x6   : > { %115 = sbr.rel (%p112_p2) target bundleno = 2240 (0x8c0), region = 28  ;;  %1198 = vmatprep.subr.mxu0 (!%p112_p2), %v1360_v1  ;;  %1200 = vmatprep.mubr.msk.f32.mxu0 (!%p112_p2), %vm1361_vm1, %v1360_v1  ;;  %v225_v2 = vld [vmem:[%s1570_s1 + $0x10] sm:$0xff] (!%p112_p2)  ;;  %v226_v3 = vld [vmem:[%s1570_s1 + $0x18] sm:$0xff] (!%p112_p2)  ;;  %v1362_v5 = vmov (!%p112_p2), 0.0|0.0   ;;  %vm146_vm2 = vcmask (!%p112_p2), 31744   ;;  %v227_v10 = vld [vmem:[%s1570_s1 + $0x20] sm:$0xff] (!%p112_p2) }
   0x7   : > { %v308_v4 = vld [vmem:[%s1570_s1 + $0x30] sm:$0xff] (!%p112_p2)  ;;  %1199 = vmatpush3.msk.msra.mxu0 (!%p112_p2), %vm150_vm0, %v140_v0  ;;  %1295 = vmatprep.subr.bf16.mxu1 (!%p112_p2), %v1362_v5  ;;  %v1296_v6 = vpack.c.bf16 (!%p112_p2), %v226_v3, %v225_v2  ;;  %v309_v7 = vld [vmem:[%s1570_s1 + $0x38] sm:$0xff] (!%p112_p2)  ;;  %v228_v11 = vld [vmem:[%s1570_s1 + $0x28] sm:$0xff] (!%p112_p2)  ;;  %vm234_vm3 = vcmask (!%p112_p2), 261120   ;;  %vm542_vm4 = vcmask (!%p112_p2), 64512   ;;  %vm1069_vm5 = vcmask (!%p112_p2), 93184  }
   0x8   : > { %1301 = vmatprep.subr.bf16.mxu0 (!%p112_p2), %v1362_v5  ;;  %1211 = vmatprep.mubr.msk.f32.mxu1 (!%p112_p2), %vm1361_vm1, %v1360_v1  ;;  %v1302_v8 = vpack.c.bf16 (!%p112_p2), %v309_v7, %v308_v4  ;;  %v1299_v12 = vpack.c.bf16 (!%p112_p2), %v228_v11, %v227_v10  ;;  %v310_v13 = vld [vmem:[%s1570_s1 + $0x40] sm:$0xff] (!%p112_p2)  ;;  %v311_v14 = vld [vmem:[%s1570_s1 + $0x48] sm:$0xff] (!%p112_p2)  ;;  %v387_v17 = vld [vmem:[%s1570_s1 + $0x50] sm:$0xff] (!%p112_p2) }
   0x9   : > { %1297 = vmatpush3.bf16.msra.mxu1 (!%p112_p2), %v1296_v6  ;;  %v1305_v15 = vpack.c.bf16 (!%p112_p2), %v311_v14, %v310_v13  ;;  %v1131_v16 = vld [vmem:[%s1570_s1 + $0x8] ss:$0 sm:$0xff] (!%p112_p2)  ;;  %v388_v18 = vld [vmem:[%s1570_s1 + $0x58] sm:$0xff] (!%p112_p2)  ;;  %v389_v24 = vld [vmem:[%s1570_s1 + $0x60] sm:$0xff] (!%p112_p2) }
   0xa   : > { %1298 = vmatprep.subr.bf16.mxu1 (!%p112_p2), %v1362_v5  ;;  %v1308_v22 = vpack.c.bf16 (!%p112_p2), %v388_v18, %v387_v17  ;;  %v390_v25 = vld [vmem:[%s1570_s1 + $0x68] sm:$0xff] (!%p112_p2)  ;;  %v1136_v27 = vld [vmem:[%s1570_s1 + $0x78] ss:$0 sm:$0xff] (!%p112_p2)  ;;  %v1134_v30 = vld [vmem:[%s1570_s1 + $0x70] ss:$0 sm:$0xff] (!%p112_p2) }
   0xb   : > { %v1311_v26 = vpack.c.bf16 (!%p112_p2), %v390_v25, %v389_v24  ;;  %v1138_v35 = vld [vmem:[%s1570_s1 + $0x80] ss:$0 sm:$0xff] (!%p112_p2)  ;;  %v627_v47 = vld [vmem:[%s1570_s1 + $0x88] sm:$0xff] (!%p112_p2)  ;;  %v628_v48 = vld [vmem:[%s1570_s1 + $0x90] sm:$0xff] (!%p112_p2) }
   0xc   : > { %v1314_v49 = vpack.c.bf16 (!%p112_p2), %v628_v48, %v627_v47  ;;  %v629_v50 = vld [vmem:[%s1570_s1 + $0x98] sm:$0xff] (!%p112_p2)  ;;  %v630_v51 = vld [vmem:[%s1570_s1 + $0xa0] sm:$0xff] (!%p112_p2)  ;;  %v709_v53 = vld [vmem:[%s1570_s1 + $0xb0] sm:$0xff] (!%p112_p2) }
   0xd   : > { %s1573_s10 = smov (!%p131_p3, %s1124_s10), 1  ;;  %1300 = vmatpush3.bf16.msra.mxu1 %v1299_v12  ;;  %v1317_v52 = vpack.c.bf16 %v630_v51, %v629_v50  ;;  %v710_v54 = vld [vmem:[%s1570_s1 + $0xb8] sm:$0xff]  ;;  %v711_v61 = vld [vmem:[%s1570_s1 + $0xc0] sm:$0xff]  ;;  %v712_v62 = vld [vmem:[%s1570_s1 + $0xc8] sm:$0xff] }
   0xe   : > { %s1129_s21 = sshll.u32 %s1573_s10, 3  ;;  %1307 = vmatprep.subr.bf16.mxu1 %v1362_v5  ;;  %v1320_v55 = vpack.c.bf16 %v710_v54, %v709_v53  ;;  %v1323_v63 = vpack.c.bf16 %v712_v62, %v711_v61  ;;  %v792_v0 = vld [vmem:[%s1570_s1 + $0xd8] sm:$0xff]  ;;  %v793_v2 = vld [vmem:[%s1570_s1 + $0xe0] sm:$0xff]  ;;  %v1143_v4 = vld [vmem:[%s1570_s1 + $0xa8] ss:$0 sm:$0xff]  ;;  %s1130_s13 = sshll.u32 %s1573_s10, 2 }
   0xf   : > { %s134_s24 = scalar_lea.vmem %s1569_s0, %s1129_s21  ;;  %v1326_v3 = vpack.c.bf16 %v793_v2, %v792_v0  ;;  %v795_v10 = vld [vmem:[%s1570_s1 + $0xf0] sm:$0xff]  ;;  %v875_v12 = vld [vmem:[%s1570_s1 + $0x100] sm:$0xff]  ;;  %v876_v13 = vld [vmem:[%s1570_s1 + $0x108] sm:$0xff]  ;;  %s138_s18 = scalar_lea.vmem %s1571_s2, %s1130_s13 }
  0x10   : > { %v139_v9 = vld [vmem:[%s134_s24] sm:$0xff]  ;;  %v1332_v14 = vpack.c.bf16 %v876_v13, %v875_v12 }
  0x11   : > { %1201 = vmatmul.mubr.msk.f32.vlgmr.msra.gmra.mrb[0].mxu0 %vm146_vm2, %v139_v9  ;;  %v794_v9 = vld [vmem:[%s1570_s1 + $0xe8] sm:$0xff] }
  0x12   : > { %1303 = vmatpush3.bf16.msra.mxu0 %v1302_v8  ;;  %1222 = vmatprep.mubr.msk.f32.mxu0 %vm1361_vm1, %v1360_v1  ;;  %v1329_v11 = vpack.c.bf16 %v795_v10, %v794_v9 }
  0x13   : > { %1304 = vmatprep.subr.bf16.mxu0 %v1362_v5 }
  0x16   : > { %1306 = vmatpush3.bf16.msra.mxu0 %v1305_v15  ;;  %v1145_v15 = vld [vmem:[%s1570_s1 + $0xd0] ss:$0 sm:$0xff] }
  0x17   : > { %1236 = vmatprep.subr.mxu0 %v1360_v1 }
  0xe4   : > { %v220_v19 = vpop.f32.mrb[0].mxu0 }
  0xe5   : > { %v221_v20 = vadd.f32 %v1131_v16, %v220_v19  ;;  %v1202_v21 = vpop.f32.mrb[1].mxu0 }
  0xe7   : > { %v224_v23 = vmax.f32 %v221_v20, 0.0  ;;  %v877_v20 = vld [vmem:[%s1570_s1 + $0x110] sm:$0xff] }
  0xe9   : > { %1212 = vmatmul.mubr.msk.f32.vlgmr.msra.gmra.mrb[0].mxu1 %vm234_vm3, %v224_v23  ;;  %1223 = vmatmul.mubr.msk.f32.vlgmr.msra.gmra.mrb[2].mxu0 %vm234_vm3, %v224_v23 }
  0xea   : > { %1309 = vmatpush3.bf16.msra.mxu1 %v1308_v22  ;;  %1233 = vmatprep.mubr.msk.f32.mxu1 %vm1361_vm1, %v1360_v1  ;;  %v1147_v22 = vld [vmem:[%s1570_s1 + $0xf8] ss:$0 sm:$0xff] }
  0xeb   : > { %1310 = vmatprep.subr.bf16.mxu1 %v1362_v5  ;;  %1238 = vmatprep.mubr.msk.f32.mxu0 %vm1361_vm1, %v1360_v1 }
  0xee   : > { %1312 = vmatpush3.bf16.msra.mxu1 %v1311_v26 }
  0xef   : > { %1313 = vmatprep.subr.bf16.mxu1 %v1362_v5 }
  0xf1   : > { %1234 = vmatmul.mubr.msk.f32.vlgmr.msra.gmra.mrb[2].mxu1 %vm234_vm3, %v224_v23 }
  0xf2   : > { %1254 = vmatprep.mubr.msk.f32.mxu1 %vm1361_vm1, %v1360_v1  ;;  %1315 = vmatpush3.bf16.msra.mxu1 %v1314_v49 }
  0xf3   : > { %1316 = vmatprep.subr.bf16.mxu1 %v1362_v5 }
  0xf6   : > { %1318 = vmatpush3.bf16.msra.mxu1 %v1317_v52 }
  0xf7   : > { %1325 = vmatprep.subr.bf16.mxu1 %v1362_v5 }
 0x1bc   : > { %v304_v28 = vpop.f32.mrb[0].mxu1  ;;  %v383_v29 = vpop.f32.mrb[2].mxu0 }
 0x1bd   : > { %v384_v31 = vadd.f32 %v1136_v27, %v383_v29  ;;  %v1213_v32 = vpop.f32.mrb[1].mxu1  ;;  %v1224_v33 = vpop.f32.mrb[3].mxu0  ;;  %v305_v34 = vadd.f32 %v1134_v30, %v304_v28  ;;  %v1149_v27 = vld [vmem:[%s1570_s1 + $0x120] ss:$0 sm:$0xff] }
 0x1be   : > { %v1151_v33 = vld [vmem:[%s1570_s1 + $0x130] ss:$0 sm:$0xff] }
 0x1bf   : > { %1237 = vmatpush3.xpose.msk.msra.mxu0 %vm234_vm3, %v384_v31 }
 0x1c0   : > { %1241 = vmatprep.subr.mxu0 %v1360_v1 }
 0x1c2   : > { %1239 = vmatmul.mubr.msk.f32.vlgmr.msra.gmra.mrb[4].mxu0 %vm234_vm3, %v305_v34 }
 0x1c3   : > { %1243 = vmatprep.mubr.msk.f32.mxu0 %vm1361_vm1, %v1360_v1 }
 0x1c4   : > { %v462_v36 = vpop.f32.mrb[2].mxu1 }
 0x1c5   : > { %v463_v37 = vadd.f32 %v1138_v35, %v462_v36  ;;  %v1235_v38 = vpop.f32.mrb[3].mxu1 }
 0x1c7   : > { %1242 = vmatpush3.msra.mxu0 %v463_v37 }
 0x1c8   : > { %1319 = vmatprep.subr.bf16.mxu0 %v1362_v5 }
 0x295   : > { %v538_v39 = vpop.f32.mrb[4].mxu0 }
 0x296   : > { %v1240_v40 = vpop.f32.mrb[5].mxu0  ;;  %v543_v41 = vsel %vm542_vm4, %v538_v39, -inf }
 0x297   : > { %544 = vmax.xlane.f32.xlu0 %v543_v41 }
 0x324   : > { %v545_v42 = vpop.xlane.xlu0 %544 }
 0x325   : > { %v546_v43 = vsub.f32 %v538_v39, %v545_v42 }
 0x327   : > { %v547_v44 = vmul.f32 1.442695, %v546_v43 }
 0x329   : > { %1348 = vpow2.f32 %v547_v44 }
 0x333   : > { %v1349_v45 = vpop.eup %1348 }
 0x334   : > { %1244 = vmatmul.mubr.msk.f32.vlgmr.msra.gmra.mrb[6].mxu0 %vm542_vm4, %v1349_v45  ;;  %v549_v46 = vsel %vm542_vm4, %v1349_v45, 0.0 }
 0x335   : > { %550 = vadd.xlane.f32.xlu0 %v549_v46  ;;  %1265 = vmatprep.mubr.msk.f32.mxu0 %vm1361_vm1, %v1360_v1 }
 0x336   : > { %1321 = vmatpush3.bf16.msra.mxu0 %v1320_v55 }
 0x337   : > { %1322 = vmatprep.subr.bf16.mxu0 %v1362_v5 }
 0x33a   : > { %1324 = vmatpush3.bf16.msra.mxu0 %v1323_v63 }
 0x33b   : > { %1331 = vmatprep.subr.bf16.mxu0 %v1362_v5 }
 0x3c2   : > { %v551_v56 = vpop.xlane.xlu0 %550 }
 0x3c3   : > { %1350 = vrcp.f32 %v551_v56 }
 0x3cd   : > { %v1351_v57 = vpop.eup %1350 }
 0x407   : > { %v622_v58 = vpop.f32.mrb[6].mxu0 }
 0x408   : > { %v626_v59 = vmul.f32 %v1351_v57, %v622_v58  ;;  %v1245_v60 = vpop.f32.mrb[7].mxu0 }
 0x40a   : > { %1255 = vmatmul.mubr.msk.f32.vlgmr.msra.gmra.mrb[4].mxu1 %vm234_vm3, %v626_v59 }
 0x40b   : > { %1276 = vmatprep.mubr.msk.f32.mxu1 %vm1361_vm1, %v1360_v1  ;;  %1327 = vmatpush3.bf16.msra.mxu1 %v1326_v3 }
 0x40c   : > { %1328 = vmatprep.subr.bf16.mxu1 %v1362_v5 }
 0x40f   : > { %1330 = vmatpush3.bf16.msra.mxu1 %v1329_v11 }
 0x410   : > { %1290 = vmatprep.subr.mxu1 %v1360_v1 }
 0x4dd   : > { %v705_v6 = vpop.f32.mrb[4].mxu1 }
 0x4de   : > { %v706_v7 = vadd.f32 %v1143_v4, %v705_v6  ;;  %v1256_v8 = vpop.f32.mrb[5].mxu1 }
 0x4e0   : > { %1266 = vmatmul.mubr.msk.f32.vlgmr.msra.gmra.mrb[8].mxu0 %vm234_vm3, %v706_v7 }
 0x4e1   : > { %1287 = vmatprep.mubr.msk.f32.mxu0 %vm1361_vm1, %v1360_v1  ;;  %1333 = vmatpush3.bf16.msra.mxu0 %v1332_v14 }
 0x4e2   : > { %1334 = vmatprep.subr.bf16.mxu0 %v1362_v5  ;;  %v878_v5 = vld [vmem:[%s1570_s1 + $0x118] sm:$0xff] }
 0x4e3   : > { %v1335_v21 = vpack.c.bf16 %v878_v5, %v877_v20 }
 0x4e5   : > { %1336 = vmatpush3.bf16.msra.mxu0 %v1335_v21 }
 0x5b3   : > { %v787_v16 = vpop.f32.mrb[8].mxu0 }
 0x5b4   : > { %v788_v17 = vadd.f32 %v1145_v15, %v787_v16  ;;  %v1267_v18 = vpop.f32.mrb[9].mxu0 }
 0x5b6   : > { %v791_v19 = vmax.f32 %v788_v17, 0.0 }
 0x5b8   : > { %1277 = vmatmul.mubr.msk.f32.vlgmr.msra.gmra.mrb[6].mxu1 %vm234_vm3, %v791_v19 }
 0x5b9   : > { %1292 = vmatprep.mubr.msk.f32.mxu1 %vm1361_vm1, %v1360_v1  ;;  %v958_v1 = vld [vmem:[%s1570_s1 + $0x128] sm:$0xff] }
 0x5ba   : > { %1291 = vmatpush3.msra.mxu1 %v958_v1 }
 0x68b   : > { %v870_v23 = vpop.f32.mrb[6].mxu1 }
 0x68c   : > { %v871_v24 = vadd.f32 %v1147_v22, %v870_v23  ;;  %v1278_v25 = vpop.f32.mrb[7].mxu1 }
 0x68e   : > { %v874_v26 = vmax.f32 %v871_v24, 0.0 }
 0x690   : > { %1288 = vmatmul.mubr.msk.f32.vlgmr.msra.gmra.mrb[10].mxu0 %vm234_vm3, %v874_v26 }
 0x763   : > { %v953_v28 = vpop.f32.mrb[10].mxu0 }
 0x764   : > { %v1289_v29 = vpop.f32.mrb[11].mxu0  ;;  %v954_v30 = vadd.f32 %v1149_v27, %v953_v28 }
 0x766   : > { %v957_v31 = vmax.f32 %v954_v30, 0.0 }
 0x768   : > { %964 = vxpose.xlu1.b32.start.end [1/1] (short) (narrow) %v957_v31, 8 }
 0x7e8   : > { %v980_v32 = vpop.trf.xlu1 }
 0x7e9   : > { %1293 = vmatmul.mubr.msk.f32.vlgmr.msra.gmra.mrb[8].mxu1 %vm542_vm4, %v980_v32 }
 0x8bc   : > { %v1065_v34 = vpop.f32.mrb[8].mxu1 }
 0x8bd   : > { %v1066_v35 = vadd.f32 %v1151_v33, %v1065_v34  ;;  %v1294_v36 = vpop.f32.mrb[9].mxu1 }
 0x8bf   : > { %1070 = vst.msk [vmem:[%s138_s18] sm:$0xf] %vm1069_vm5, %v1066_v35 }
 0x8c0 PF: > { %s12_s9 = sadd.s32 1, %s1358_s9  }
 0x8c1   : > { %p9_p4 = scmp.ge.s32.totalorder %s12_s9, 4  }
 0x8c3   :  { %11 = sbr.rel (!%p9_p4) target bundleno = 1 (0x1), region = 58 }

</bundles_post_ra>
